<compile_context>
chip_gen: v5e
topology: v5e:2x2
jax: 0.10.0
libtpu: 0.0.40
codegen_flags: <defaults>
</compile_context>

<pallas_src>
import jax
import jax.numpy as jnp
from jax import lax
from jax.experimental import pallas as pl
from jax.experimental.pallas import tpu as pltpu


def _conv_stats_kernel(a_ref, w_ref, y_ref, stat_ref):
    """Fused ReLU + conv-as-GEMM tile (lane-dense M) + per-tile channel stats."""
    a = jnp.maximum(a_ref[...], 0.0)                                   # fused ReLU (bf16)
    y = jnp.dot(w_ref[...], a, preferred_element_type=jnp.float32)     # (C_pad, tm) f32
    y_ref[...] = y
    s1 = jnp.sum(y, axis=1, keepdims=True)                             # (C_pad, 1)
    s2 = jnp.sum(y * y, axis=1, keepdims=True)                         # (C_pad, 1)
    stat_ref[...] = jnp.concatenate([s1, s2], axis=1)[None]            # (1, C_pad, 2)


def _bn_kernel(y_ref, scale_ref, shift_ref, o_ref):
    """BatchNorm apply: pure per-channel FMA (scale/shift precomputed once)."""
    o_ref[...] = y_ref[...] * scale_ref[...] + shift_ref[...]


def relu_conv_bn(x_nchw, weight_oihw, gamma, beta, *, stride, padding,
                 eps=1e-5, tm=512):
    N, C_in, H, W = x_nchw.shape
    C_out, _, KH, KW = weight_oihw.shape
    Ho = (H + 2 * padding - KH) // stride + 1
    Wo = (W + 2 * padding - KW) // stride + 1
    K = C_in * KH * KW
    M = N * Ho * Wo

    assert tm % 128 == 0, "tm must be a multiple of 128 (lane width)"
    m_pad = pl.cdiv(M, tm) * tm
    n_tiles = m_pad // tm
    C_pad = pl.cdiv(C_out, 8) * 8                  # sublane-align the channel axis

    # --- glue: one fused patch gather (im2col), kept in bf16 for the GEMM ---
    # feature order of patches is c_in-major then (kh, kw) -> matches the
    # PyTorch OIHW weight reshape below.
    x_bf = x_nchw.astype(jnp.bfloat16)
    patches = lax.conv_general_dilated_patches(
        x_bf, filter_shape=(KH, KW), window_strides=(stride, stride),
        padding=[(padding, padding), (padding, padding)])       # (N, K, Ho, Wo)
    AT = jnp.transpose(patches, (1, 0, 2, 3)).reshape(K, M)     # (K, M)
    if m_pad != M:
        # zero columns contribute 0 to sum/sumsq; we divide by the true M below
        AT = jnp.pad(AT, ((0, 0), (0, m_pad - M)))

    WT = weight_oihw.reshape(C_out, K).astype(jnp.bfloat16)     # (C_out, K)
    if C_pad != C_out:
        WT = jnp.pad(WT, ((0, C_pad - C_out), (0, 0)))

    # TODO(synk): for large K (many input channels) add a trailing "arbitrary"
    # K grid axis with an f32 VMEM accumulator so the per-step footprint stays
    # bounded under v7x's 64 MiB VMEM instead of taking full-K blocks.

    # ---- pass 1: fused ReLU + conv GEMM + per-tile partial stats ----
    yT, part = pl.pallas_call(
        _conv_stats_kernel,
        out_shape=(jax.ShapeDtypeStruct((C_pad, m_pad), jnp.float32),
                   jax.ShapeDtypeStruct((n_tiles, C_pad, 2), jnp.float32)),
        grid_spec=pltpu.PrefetchScalarGridSpec(
            num_scalar_prefetch=0,
            grid=(n_tiles,),
            in_specs=[pl.BlockSpec((K, tm), lambda i: (0, i)),
                      pl.BlockSpec((C_pad, K), lambda i: (0, 0))],
            out_specs=[pl.BlockSpec((C_pad, tm), lambda i: (0, i)),
                       pl.BlockSpec((1, C_pad, 2), lambda i: (i, 0, 0))]),
        compiler_params=pltpu.CompilerParams(
            dimension_semantics=("parallel",)),
    )(AT, WT)

    # ---- tiny glue: fold partial stats -> per-channel scale/shift (once) ----
    sums = jnp.sum(part, axis=0)                                 # (C_pad, 2)
    mean = sums[:, 0:1] / M                                      # (C_pad, 1)
    ex2 = sums[:, 1:2] / M
    var = jnp.maximum(ex2 - mean * mean, 0.0)                    # biased var, clamped
    inv = lax.rsqrt(var + eps)
    gamma_p = jnp.pad(gamma.astype(jnp.float32).reshape(C_out, 1),
                      ((0, C_pad - C_out), (0, 0)))
    beta_p = jnp.pad(beta.astype(jnp.float32).reshape(C_out, 1),
                     ((0, C_pad - C_out), (0, 0)))
    scale = gamma_p * inv                                        # (C_pad, 1)
    shift = beta_p - mean * scale                                # (C_pad, 1)

    # ---- pass 2: BN apply, in place over the conv buffer ----
    outT = pl.pallas_call(
        _bn_kernel,
        out_shape=jax.ShapeDtypeStruct((C_pad, m_pad), jnp.float32),
        grid_spec=pltpu.PrefetchScalarGridSpec(
            num_scalar_prefetch=0,
            grid=(n_tiles,),
            in_specs=[pl.BlockSpec((C_pad, tm), lambda i: (0, i)),
                      pl.BlockSpec((C_pad, 1), lambda i: (0, 0)),
                      pl.BlockSpec((C_pad, 1), lambda i: (0, 0))],
            out_specs=pl.BlockSpec((C_pad, tm), lambda i: (0, i))),
        input_output_aliases={0: 0},
        compiler_params=pltpu.CompilerParams(
            dimension_semantics=("parallel",)),
    )(yT, scale, shift)

    out = outT[:C_out, :M].reshape(C_out, N, Ho, Wo)
    return jnp.transpose(out, (1, 0, 2, 3))                      # back to NCHW


if __name__ == "__main__":
    key = jax.random.PRNGKey(0)
    kx, kw = jax.random.split(key)

    # ReLUConvBN(C_in=4, C_out=8, kernel_size=3, stride=1, padding=1, affine=True)
    N, C_in, H, W = 2, 4, 16, 16
    C_out, ksize, stride, padding = 8, 3, 1, 1

    x = jax.random.normal(kx, (N, C_in, H, W), jnp.float32)
    weight = 0.1 * jax.random.normal(kw, (C_out, C_in, ksize, ksize), jnp.float32)
    gamma = jnp.ones((C_out,), jnp.float32)     # BatchNorm affine init
    beta = jnp.zeros((C_out,), jnp.float32)

    out = relu_conv_bn(x, weight, gamma, beta, stride=stride, padding=padding)
    out = jax.block_until_ready(out)

    # reference with the same bf16 quantization of the GEMM inputs (f32 accum)
    xr = jnp.maximum(x, 0.0).astype(jnp.bfloat16).astype(jnp.float32)
    wr = weight.astype(jnp.bfloat16).astype(jnp.float32)
    y = lax.conv_general_dilated(
        xr, wr, window_strides=(stride, stride),
        padding=[(padding, padding), (padding, padding)],
        dimension_numbers=("NCHW", "OIHW", "NCHW"))
    mean = jnp.mean(y, axis=(0, 2, 3), keepdims=True)
    var = jnp.var(y, axis=(0, 2, 3), keepdims=True)
    ref = (y - mean) * lax.rsqrt(var + 1e-5) * gamma.reshape(1, -1, 1, 1) \
        + beta.reshape(1, -1, 1, 1)

    assert out.shape == ref.shape == (N, C_out, H, W)
    assert jnp.allclose(out, ref, atol=5e-3, rtol=5e-3), \
        float(jnp.max(jnp.abs(out - ref)))
    print("KERNEL_OK")
</pallas_src>

<mosaic_0001>
module attributes {stable_mosaic.version = 11 : i64} {
  func.func @_conv_stats_kernel(%arg0: i32, %arg1: memref<36x512xbf16, #tpu.memory_space<vmem>>, %arg2: memref<8x36xbf16, #tpu.memory_space<vmem>>, %arg3: memref<8x512xf32, #tpu.memory_space<vmem>>, %arg4: memref<1x8x2xf32, #tpu.memory_space<vmem>>) attributes {dimension_semantics = [#tpu.dimension_semantics<parallel>], iteration_bounds = array<i64: 1>, scalar_prefetch = 0 : i64, scratch_operands = 0 : i64, tpu.core_type = #tpu.core_type<tc>, window_params = [{transform_indices = @transform_0, window_bounds = array<i64: 36, 512>}, {pipeline_mode = #tpu.pipeline_mode<synchronous>, transform_indices = @transform_1, window_bounds = array<i64: 8, 36>}, {transform_indices = @transform_2, window_bounds = array<i64: 8, 512>}, {transform_indices = @transform_3, window_bounds = array<i64: 1, 8, 2>}]} {
    %c0 = arith.constant 0 : index
    %c0_0 = arith.constant 0 : index
    %0 = vector.load %arg1[%c0, %c0_0] : memref<36x512xbf16, #tpu.memory_space<vmem>>, vector<36x512xbf16>
    %cst = arith.constant 0.000000e+00 : bf16
    %1 = vector.broadcast %cst : bf16 to vector<36x512xbf16>
    %2 = arith.maximumf %0, %1 : vector<36x512xbf16>
    %c0_1 = arith.constant 0 : index
    %c0_2 = arith.constant 0 : index
    %3 = vector.load %arg2[%c0_1, %c0_2] : memref<8x36xbf16, #tpu.memory_space<vmem>>, vector<8x36xbf16>
    %cst_3 = arith.constant dense<0.000000e+00> : vector<8x512xf32>
    %4 = tpu.matmul %3, %2, %cst_3 {dimension_numbers = #tpu.dot_dimension_numbers<[1], [0], [0], [1], [0, 0, 1, 1], [], []>} : vector<8x36xbf16>, vector<36x512xbf16>, vector<8x512xf32> -> vector<8x512xf32>
    %c0_4 = arith.constant 0 : index
    %c0_5 = arith.constant 0 : index
    %5 = vector.load %arg3[%c0_4, %c0_5] : memref<8x512xf32, #tpu.memory_space<vmem>>, vector<8x512xf32>
    tpu.vector_store %arg3[%c0_4, %c0_5], %4 {strides = array<i32>} : memref<8x512xf32, #tpu.memory_space<vmem>>, vector<8x512xf32>,
    %cst_6 = arith.constant dense<0.000000e+00> : vector<8xf32>
    %6 = vector.multi_reduction <add>, %4, %cst_6 [1] : vector<8x512xf32> to vector<8xf32>
    %7 = vector.shape_cast %6 : vector<8xf32> to vector<8x1xf32>
    %8 = arith.mulf %4, %4 : vector<8x512xf32>
    %cst_7 = arith.constant dense<0.000000e+00> : vector<8xf32>
    %9 = vector.multi_reduction <add>, %8, %cst_7 [1] : vector<8x512xf32> to vector<8xf32>
    %10 = vector.shape_cast %9 : vector<8xf32> to vector<8x1xf32>
    %11 = tpu.concatenate %7, %10 in 1 : vector<8x1xf32>, vector<8x1xf32> -> vector<8x2xf32>
    %12 = vector.shape_cast %11 : vector<8x2xf32> to vector<1x8x2xf32>
    %c0_8 = arith.constant 0 : index
    %c0_9 = arith.constant 0 : index
    %c0_10 = arith.constant 0 : index
    %13 = vector.load %arg4[%c0_8, %c0_9, %c0_10] : memref<1x8x2xf32, #tpu.memory_space<vmem>>, vector<1x8x2xf32>
    tpu.vector_store %arg4[%c0_8, %c0_9, %c0_10], %12 {strides = array<i32>} : memref<1x8x2xf32, #tpu.memory_space<vmem>>, vector<1x8x2xf32>,
    return
  }
  func.func @transform_0(%arg0: i32) -> (i32, i32) {
    %c0_i32 = arith.constant 0 : i32
    %c0_i32_0 = arith.constant 0 : i32
    return %c0_i32, %arg0 : i32, i32
  }
  func.func @transform_1(%arg0: i32) -> (i32, i32) {
    %c0_i32 = arith.constant 0 : i32
    %c0_i32_0 = arith.constant 0 : i32
    %c0_i32_1 = arith.constant 0 : i32
    return %c0_i32, %c0_i32_0 : i32, i32
  }
  func.func @transform_2(%arg0: i32) -> (i32, i32) {
    %c0_i32 = arith.constant 0 : i32
    %c0_i32_0 = arith.constant 0 : i32
    return %c0_i32, %arg0 : i32, i32
  }
  func.func @transform_3(%arg0: i32) -> (i32, i32, i32) {
    %c0_i32 = arith.constant 0 : i32
    %c0_i32_0 = arith.constant 0 : i32
    %c0_i32_1 = arith.constant 0 : i32
    return %arg0, %c0_i32, %c0_i32_0 : i32, i32, i32
  }
}

</mosaic_0001>

<bundles_post_ra>
// kernel: tpu_custom_call.1
= control target key start
LH: loop header
LB: loop body
LE: loop exit
PB: predicated region body
PF: predicated region fallthrough
CT: control target
= control target key end

     0   :  { %9 = vsyncpa [#allocation3], 0  ;;  %s349_s0 = inlined_call_operand.hbm [shape: bf16[36,512], index: 0, kind: input, shape index: {}]   ;;  %s350_s1 = inlined_call_operand.hbm [shape: bf16[8,36], index: 1, kind: input, shape index: {}]   ;;  %s351_s2 = inlined_call_operand.hbm [shape: f32[8,512], index: 2, kind: output, shape index: {0}]   ;;  %s352_s3 = inlined_call_operand.vmem [shape: f32[1,8,2], index: 3, kind: output, shape index: {1}]  }
   0x1   :  { %10 = vsyncpa [#allocation6], 0 }
   0x2   :  { %11 = vsyncpa [#allocation4], 0  ;;  %s16_s14 = sshll.u32 %s349_s0, 4  ;;  %s308_s15 = smov [#allocation2]   ;;  %s17_s14 = int_to_ptr.hbm [resolvable:$true] %s16_s14 }
   0x3   :  { %s18_s16 = sshll.u32 %s308_s15, 4  ;;  %s30_s19 = sshll.u32 %s350_s1, 4  ;;  %s19_s16 = int_to_ptr.vmem [resolvable:$true] %s18_s16  ;;  %s31_s19 = int_to_ptr.hbm [resolvable:$true] %s30_s19 }
   0x4   :  { %s309_s20 = smov 256   ;;  %s310_s21 = smov 16  }
   0x5   :  { %24 = dma.hbm_to_vmem [thread:$0]  %s17_s14, 1280, %s19_s16, [#allocation3], %s309_s20, %s309_s20, %s310_s21  }
   0x6   :  { %s311_s22 = smov [#allocation5]  }
   0x7   :  { %s32_s23 = sshll.u32 %s311_s22, 4  ;;  %s33_s23 = int_to_ptr.vmem [resolvable:$true] %s32_s23 }
   0x8   :  { %35 = dma.hbm_to_vmem [thread:$0]  %s31_s19, 64, %s33_s23, [#allocation6]  }
   0x9   :  { %302 = dma.done.wait [#allocation3], 1280  }
   0xa   :  { %303 = vsyncadd [#allocation3], 4294966016 }
   0xb   :  { %304 = dma.done.wait [#allocation6], 64  }
   0xc   :  { %305 = vsyncadd [#allocation6], 4294967232  ;;  %v53_v0 = vld [vmem:[#allocation2 + $0x40] sm:$0x33]  ;;  %vm112_vm0 = vcmask 1041408   ;;  %v51_v7 = vld [vmem:[#allocation2 + $0x30] sm:$0xff] }
   0xd   :  { %v54_v1 = vld [vmem:[#allocation2 + $0x48] sm:$0x33]  ;;  %v49_v2 = vld [vmem:[#allocation2 + $0x20] sm:$0xff]  ;;  %v71_v3 = vunpack.c.l.bf16 %v53_v0  ;;  %v72_v4 = vunpack.c.h.bf16 %v53_v0  ;;  %v67_v9 = vunpack.c.l.bf16 %v51_v7  ;;  %v68_v11 = vunpack.c.h.bf16 %v51_v7  ;;  %v52_v17 = vld [vmem:[#allocation2 + $0x38] sm:$0xff]  ;;  %s312_s0 = smov [#allocation7]   ;;  %s206_s26 = sshll.u32 %s351_s2, 4  ;;  %s207_s26 = int_to_ptr.hbm [resolvable:$true] %s206_s26 }
   0xe   :  { %v73_v5 = vunpack.c.l.bf16 %v54_v1  ;;  %v74_v6 = vunpack.c.h.bf16 %v54_v1  ;;  %v63_v8 = vunpack.c.l.bf16 %v49_v2  ;;  %v64_v10 = vunpack.c.h.bf16 %v49_v2  ;;  %v50_v16 = vld [vmem:[#allocation2 + $0x28] sm:$0xff]  ;;  %v45_v30 = vld [vmem:[#allocation2] sm:$0xff]  ;;  %v47_v31 = vld [vmem:[#allocation2 + $0x10] sm:$0xff]  ;;  %s204_s1 = sshll.u32 %s312_s0, 4  ;;  %s205_s1 = int_to_ptr.vmem [resolvable:$true] %s204_s1 }
   0xf   :  { %v91_v12 = vmax.f32 %v71_v3, 0.0  ;;  %v92_v13 = vmax.f32 %v72_v4, 0.0  ;;  %v87_v19 = vmax.f32 %v67_v9, 0.0  ;;  %v88_v21 = vmax.f32 %v68_v11, 0.0  ;;  %v46_v36 = vld [vmem:[#allocation2 + $0x8] sm:$0xff]  ;;  %v48_v45 = vld [vmem:[#allocation2 + $0x18] sm:$0xff] }
  0x10   :  { %v93_v14 = vmax.f32 %v73_v5, 0.0  ;;  %v94_v15 = vmax.f32 %v74_v6, 0.0  ;;  %v83_v18 = vmax.f32 %v63_v8, 0.0  ;;  %v84_v20 = vmax.f32 %v64_v10, 0.0  ;;  %v107_v1 = vld [vmem:[#allocation5] sm:$0xf] }
  0x11   :  { %v103_v22 = vpack.c.bf16 %v91_v12, %v91_v12  ;;  %v104_v23 = vpack.c.bf16 %v92_v13, %v92_v13  ;;  %v65_v28 = vunpack.c.l.bf16 %v50_v16  ;;  %v69_v29 = vunpack.c.l.bf16 %v52_v17 }
  0x12   :  { %v105_v24 = vpack.c.bf16 %v93_v14, %v93_v14  ;;  %v106_v25 = vpack.c.bf16 %v94_v15, %v94_v15  ;;  %v99_v26 = vpack.c.bf16 %v87_v19, %v83_v18  ;;  %v100_v27 = vpack.c.bf16 %v88_v21, %v84_v20 }
  0x13   :  { %v114_v32 = vsel %vm112_vm0, %v103_v22, 0  ;;  %v117_v33 = vsel %vm112_vm0, %v104_v23, 0  ;;  %v85_v37 = vmax.f32 %v65_v28, 0.0  ;;  %v89_v38 = vmax.f32 %v69_v29, 0.0 }
  0x14   :  { %v120_v34 = vsel %vm112_vm0, %v105_v24, 0  ;;  %v123_v35 = vsel %vm112_vm0, %v106_v25, 0  ;;  %130 = vmatpush.bf16.msra.mxu0 %v114_v32  ;;  %143 = vmatpush.bf16.msra.mxu1 %v117_v33  ;;  %v66_v39 = vunpack.c.h.bf16 %v50_v16  ;;  %v70_v40 = vunpack.c.h.bf16 %v52_v17 }
  0x15   :  { %156 = vmatpush.bf16.msra.mxu2 %v120_v34  ;;  %169 = vmatpush.bf16.msra.mxu3 %v123_v35  ;;  %v55_v41 = vunpack.c.l.bf16 %v45_v30  ;;  %v59_v42 = vunpack.c.l.bf16 %v47_v31  ;;  %v56_v43 = vunpack.c.h.bf16 %v45_v30  ;;  %v60_v44 = vunpack.c.h.bf16 %v47_v31 }
  0x16   :  { %v101_v46 = vpack.c.bf16 %v89_v38, %v85_v37  ;;  %v86_v47 = vmax.f32 %v66_v39, 0.0  ;;  %v90_v48 = vmax.f32 %v70_v40, 0.0  ;;  %v57_v49 = vunpack.c.l.bf16 %v46_v36 }
  0x17   :  { %v75_v50 = vmax.f32 %v55_v41, 0.0  ;;  %v79_v51 = vmax.f32 %v59_v42, 0.0  ;;  %v76_v52 = vmax.f32 %v56_v43, 0.0  ;;  %v80_v53 = vmax.f32 %v60_v44, 0.0 }
  0x18   :  { %131 = vmatpush.bf16.msra.mxu0 %v99_v26  ;;  %144 = vmatpush.bf16.msra.mxu1 %v100_v27  ;;  %v102_v54 = vpack.c.bf16 %v90_v48, %v86_v47  ;;  %v61_v55 = vunpack.c.l.bf16 %v48_v45  ;;  %v77_v56 = vmax.f32 %v57_v49, 0.0  ;;  %v58_v57 = vunpack.c.h.bf16 %v46_v36 }
  0x19   :  { %157 = vmatpush.bf16.msra.mxu2 %v101_v46  ;;  %v95_v58 = vpack.c.bf16 %v79_v51, %v75_v50  ;;  %v96_v59 = vpack.c.bf16 %v80_v53, %v76_v52  ;;  %v62_v60 = vunpack.c.h.bf16 %v48_v45  ;;  %vm108_vm1 = vcmask 293888  }
  0x1a   :  { %170 = vmatpush.bf16.msra.mxu3 %v102_v54  ;;  %v81_v61 = vmax.f32 %v61_v55, 0.0  ;;  %v78_v62 = vmax.f32 %v58_v57, 0.0  ;;  %vm195_vm2 = vcmask 7168   ;;  %vm197_vm3 = vcmask 15360  }
  0x1b   :  { %v82_v63 = vmax.f32 %v62_v60, 0.0 }
  0x1c   :  { %132 = vmatpush.bf16.msra.mxu0 %v95_v58  ;;  %145 = vmatpush.bf16.msra.mxu1 %v96_v59  ;;  %v97_v0 = vpack.c.bf16 %v81_v61, %v77_v56 }
  0x1d   :  { %v98_v2 = vpack.c.bf16 %v82_v63, %v78_v62 }
  0x1e   :  { %158 = vmatpush.bf16.msra.mxu2 %v97_v0 }
  0x1f   :  { %171 = vmatpush.bf16.msra.mxu3 %v98_v2  ;;  %221 = vmatmul.msk.bf16.vlgmr.msra.gmra.mxu0 %vm108_vm1, %v107_v1 }
  0x20   :  { %222 = vmatmul.msk.bf16.vlgmr.msra.gmra.mxu1 %vm108_vm1, %v107_v1 }
  0x21   :  { %223 = vmatmul.msk.bf16.vlgmr.msra.gmra.mxu2 %vm108_vm1, %v107_v1 }
  0x22   :  { %224 = vmatmul.msk.bf16.vlgmr.msra.gmra.mxu3 %vm108_vm1, %v107_v1 }
  0x9c   :  { %v134_v3 = vpop.f32.mrf.mxu0 }
  0x9d   :  { %177 = vst [vmem:[#allocation7] sm:$0xff] %v134_v3  ;;  %v147_v4 = vpop.f32.mrf.mxu1  ;;  %v186_v6 = vmul.f32 %v134_v3, %v134_v3 }
  0x9e   :  { %178 = vst [vmem:[#allocation7 + $0x8] sm:$0xff] %v147_v4  ;;  %v181_v5 = vadd.f32 %v147_v4, %v134_v3  ;;  %v187_v7 = vmul.f32 %v147_v4, %v147_v4 }
  0xa0   :  { %v190_v15 = vadd.f32 %v187_v7, %v186_v6 }
  0xa4   :  { %v160_v8 = vpop.f32.mrf.mxu2  ;;  %v136_v9 = vpop.f32.mrf.mxu0 }
  0xa5   :  { %179 = vst [vmem:[#allocation7 + $0x10] sm:$0xff] %v160_v8  ;;  %v173_v10 = vpop.f32.mrf.mxu3  ;;  %v149_v11 = vpop.f32.mrf.mxu1  ;;  %v182_v12 = vadd.f32 %v181_v5, %v160_v8  ;;  %v188_v13 = vmul.f32 %v160_v8, %v160_v8 }
  0xa6   :  { %180 = vst [vmem:[#allocation7 + $0x18] sm:$0xff] %v173_v10  ;;  %v189_v16 = vmul.f32 %v173_v10, %v173_v10 }
  0xa7   :  { %v183_v14 = vadd.f32 %v182_v12, %v173_v10  ;;  %209 = dma.vmem_to_hbm [thread:$0]  %s205_s1, 512, %s207_s26, [#allocation4]   ;;  %v191_v17 = vadd.f32 %v190_v15, %v188_v13 }
  0xa9   :  { %184 = vadd.xlane.f32.xlu0 %v183_v14  ;;  %v192_v20 = vadd.f32 %v191_v17, %v189_v16 }
  0xac   :  { %v162_v18 = vpop.f32.mrf.mxu2 }
  0xad   :  { %v175_v19 = vpop.f32.mrf.mxu3 }
  0xb1   :  { %193 = vadd.xlane.f32.xlu0 %v192_v20 }
 0x11c   :  { %v185_v21 = vpop.xlane.xlu0 %184 }
 0x124   :  { %v194_v22 = vpop.xlane.xlu0 %193 }
 0x125   :  { %v196_v23 = vsel %vm195_vm2, %v185_v21, %v194_v22 }
 0x126   :  { %198 = vst.msk [vmem:[%s352_s3] sm:$0xff] %vm197_vm3, %v196_v23 }
 0x127   :  { %306 = dma.done.wait [#allocation4], 512  }
 0x128   :  { %307 = vsyncadd [#allocation4], 4294966784 }
 0x129   :  { %218 = vsyncpa [#allocation3], 1 }
 0x12a   :  { %219 = vsyncpa [#allocation6], 1 }
 0x12b   :  { %220 = vsyncpa [#allocation4], 1 }

</bundles_post_ra>
